<compile_context>
chip_gen: v6e
topology: v6e:2x2x1
jax: 0.10.0
libtpu: 0.0.40
codegen_flags: <defaults>
</compile_context>

<pallas_src>
import jax
import jax.numpy as jnp
from jax.experimental import pallas as pl
from jax.experimental.pallas import tpu as pltpu

D_IN = 42 * 2      # get_input_size()
H = 150
D_OUT = 3

# MXU / lane aligned padded sizes (internal only).
H_PAD = 256        # 150 -> 256 (hidden width, lane-aligned)
LOGIT_PAD = 128    # logits kept lane-wide inside the kernel
D_OUT_STORE = 8    # narrow lane-dense output slab actually written to HBM

NEG_MASK = -1e30   # bias value for padded logit columns -> exp underflows to 0


def _round_up(n, m):
    return (n + m - 1) // m * m


def mlp_softmax_kernel(x_ref, w1_ref, b1_ref, w2_ref, b2_ref, w3_ref, b3_ref,
                       o_ref):
    # MXU: bf16 operands, f32 accumulation. VPU/EUP: f32 everywhere.
    x = x_ref[...].astype(jnp.bfloat16)                                # (TB, 84)

    h1 = jnp.dot(x, w1_ref[...], preferred_element_type=jnp.float32)  # (TB, 256)
    h1 = jnp.maximum(h1 + b1_ref[...], 0.0)

    h2 = jnp.dot(h1.astype(jnp.bfloat16), w2_ref[...],
                 preferred_element_type=jnp.float32)                   # (TB, 256)
    h2 = jnp.maximum(h2 + b2_ref[...], 0.0)

    logits = jnp.dot(h2.astype(jnp.bfloat16), w3_ref[...],
                     preferred_element_type=jnp.float32)               # (TB, 128)
    # b3 carries NEG_MASK in columns >= D_OUT, so padded logits never win the
    # max and exp() underflows them to 0 (mask baked in, no iota/where).
    logits = logits + b3_ref[...]

    # Narrow to the 8 lanes we actually store before doing the softmax work.
    lg = logits[:, :D_OUT_STORE]                                       # (TB, 8)
    m = jnp.max(lg, axis=-1, keepdims=True)
    e = jnp.exp(lg - m)
    denom = jnp.sum(e, axis=-1, keepdims=True)
    # Exact reciprocal: negligible cost here and rows sum to 1 exactly.
    o_ref[...] = e * pl.reciprocal(denom, approx=False)


def prepare_kernel_params(params):
    """Pad params to kernel shapes: bf16 weights, f32 biases, masked b3.

    W1 keeps its natural 84-row contraction dim (no input-dim padding); only
    the hidden/output widths are padded for lane alignment.
    """
    w1 = jnp.zeros((D_IN, H_PAD), jnp.bfloat16)
    w1 = w1.at[:, :H].set(params["w1"].astype(jnp.bfloat16))
    w2 = jnp.zeros((H_PAD, H_PAD), jnp.bfloat16)
    w2 = w2.at[:H, :H].set(params["w2"].astype(jnp.bfloat16))
    w3 = jnp.zeros((H_PAD, LOGIT_PAD), jnp.bfloat16)
    w3 = w3.at[:H, :D_OUT].set(params["w3"].astype(jnp.bfloat16))

    b1 = jnp.zeros((1, H_PAD), jnp.float32).at[:, :H].set(params["b1"])
    b2 = jnp.zeros((1, H_PAD), jnp.float32).at[:, :H].set(params["b2"])
    b3 = jnp.full((1, LOGIT_PAD), NEG_MASK, jnp.float32)
    b3 = b3.at[:, :D_OUT].set(params["b3"])
    return (w1, b1, w2, b2, w3, b3)


def model_forward(x, kparams):
    """x: (B, D_IN) float32. Returns (B, D_OUT) float32 softmax probs."""
    B = x.shape[0]
    w1, b1, w2, b2, w3, b3 = kparams

    # Batch tile: multiple of 8 (f32 sublanes), capped at 1024.  1024 rows
    # amortize the per-step pipeline overhead; for B > 1024 the grid has >= 2
    # steps, so the parallel batch axis shards across v7x's 2 TensorCores.
    TB = min(1024, _round_up(max(B, 1), 8))
    grid = (pl.cdiv(B, TB),)

    # Rows >= B of the last partial x block hold unspecified data; every op in
    # the kernel is row-wise, so garbage stays confined to rows we never emit.
    resident = lambda shape: pl.BlockSpec(shape, lambda i: (0, 0))

    out = pl.pallas_call(
        mlp_softmax_kernel,
        out_shape=jax.ShapeDtypeStruct((B, D_OUT_STORE), jnp.float32),
        grid=grid,
        in_specs=[
            pl.BlockSpec((TB, D_IN), lambda i: (i, 0)),   # streamed x tile
            resident((D_IN, H_PAD)),  resident((1, H_PAD)),
            resident((H_PAD, H_PAD)), resident((1, H_PAD)),
            resident((H_PAD, LOGIT_PAD)), resident((1, LOGIT_PAD)),
        ],
        out_specs=pl.BlockSpec((TB, D_OUT_STORE), lambda i: (i, 0)),
        compiler_params=pltpu.CompilerParams(
            dimension_semantics=("parallel",)),
    )(x.astype(jnp.float32), w1, b1, w2, b2, w3, b3)

    return out[:, :D_OUT]


def init_params(key):
    """Deterministic init matching the PyTorch module's parameter shapes.

    PyTorch Linear stores weight as (out, in); we store the transpose
    (in, out) so the kernel does x @ W directly.
    """
    k1, k2, k3, k4, k5, k6 = jax.random.split(key, 6)

    def uniform(k, shape, fan_in):
        bound = 1.0 / jnp.sqrt(jnp.float32(fan_in))
        return jax.random.uniform(k, shape, jnp.float32, -bound, bound)

    return {
        "w1": uniform(k1, (D_IN, H), D_IN),
        "b1": uniform(k2, (1, H), D_IN),
        "w2": uniform(k3, (H, H), H),
        "b2": uniform(k4, (1, H), H),
        "w3": uniform(k5, (H, D_OUT), H),
        "b3": uniform(k6, (1, D_OUT), H),
    }


def reference_forward_f32(x, params):
    h1 = jnp.maximum(x @ params["w1"] + params["b1"], 0.0)
    h2 = jnp.maximum(h1 @ params["w2"] + params["b2"], 0.0)
    return jax.nn.softmax(h2 @ params["w3"] + params["b3"], axis=-1)


def reference_forward_bf16(x, params):
    """Mirrors the kernel's bf16-operand / f32-accumulate matmul path."""
    dot = lambda a, w: jnp.dot(a.astype(jnp.bfloat16), w.astype(jnp.bfloat16),
                               preferred_element_type=jnp.float32)
    h1 = jnp.maximum(dot(x, params["w1"]) + params["b1"], 0.0)
    h2 = jnp.maximum(dot(h1, params["w2"]) + params["b2"], 0.0)
    return jax.nn.softmax(dot(h2, params["w3"]) + params["b3"], axis=-1)


# TODO(synk): predict_victor / units_to_model_data are host-side game-state
# munging (pysc2 unit groups) and have no Pallas equivalent; only the nn
# forward pass is implemented here.

if __name__ == "__main__":
    key = jax.random.PRNGKey(0)
    kp, kx = jax.random.split(key)
    params = init_params(kp)
    kparams = prepare_kernel_params(params)

    # Small batch of synthetic unit-count feature vectors (B, D_in) = (2, 84).
    # NOTE: at B=2 this path is launch/weight-DMA latency bound; batch many
    # game states per call (B >= several hundred) to actually use the MXU.
    B = 2
    x = jax.random.randint(kx, (B, D_IN), 0, 10).astype(jnp.float32)

    out = jax.block_until_ready(model_forward(x, kparams))

    ref_bf16 = reference_forward_bf16(x, params)
    ref_f32 = reference_forward_f32(x, params)

    assert out.shape == (B, D_OUT)
    assert jnp.allclose(jnp.sum(out, axis=-1), 1.0, atol=1e-3)
    assert jnp.allclose(out, ref_bf16, atol=2e-3, rtol=2e-3), \
        "mismatch vs bf16-faithful reference"
    assert jnp.allclose(out, ref_f32, atol=3e-2, rtol=3e-2), \
        "mismatch vs f32 reference"

    print("KERNEL_OK")
</pallas_src>

<mosaic_0001>
module attributes {stable_mosaic.version = 11 : i64} {
  func.func @mlp_softmax_kernel(%arg0: i32, %arg1: memref<8x84xf32, #tpu.memory_space<vmem>>, %arg2: memref<84x256xbf16, #tpu.memory_space<vmem>>, %arg3: memref<1x256xf32, #tpu.memory_space<vmem>>, %arg4: memref<256x256xbf16, #tpu.memory_space<vmem>>, %arg5: memref<1x256xf32, #tpu.memory_space<vmem>>, %arg6: memref<256x128xbf16, #tpu.memory_space<vmem>>, %arg7: memref<1x128xf32, #tpu.memory_space<vmem>>, %arg8: memref<8x8xf32, #tpu.memory_space<vmem>>) attributes {dimension_semantics = [#tpu.dimension_semantics<parallel>], iteration_bounds = array<i64: 1>, scalar_prefetch = 0 : i64, scratch_operands = 0 : i64, tpu.core_type = #tpu.core_type<tc>, window_params = [{transform_indices = @transform_0, window_bounds = array<i64: 8, 84>}, {pipeline_mode = #tpu.pipeline_mode<synchronous>, transform_indices = @transform_1, window_bounds = array<i64: 84, 256>}, {pipeline_mode = #tpu.pipeline_mode<synchronous>, transform_indices = @transform_2, window_bounds = array<i64: 1, 256>}, {pipeline_mode = #tpu.pipeline_mode<synchronous>, transform_indices = @transform_3, window_bounds = array<i64: 256, 256>}, {pipeline_mode = #tpu.pipeline_mode<synchronous>, transform_indices = @transform_4, window_bounds = array<i64: 1, 256>}, {pipeline_mode = #tpu.pipeline_mode<synchronous>, transform_indices = @transform_5, window_bounds = array<i64: 256, 128>}, {pipeline_mode = #tpu.pipeline_mode<synchronous>, transform_indices = @transform_6, window_bounds = array<i64: 1, 128>}, {transform_indices = @transform_7, window_bounds = array<i64: 8, 8>}]} {
    %c0 = arith.constant 0 : index
    %c0_0 = arith.constant 0 : index
    %0 = vector.load %arg1[%c0, %c0_0] : memref<8x84xf32, #tpu.memory_space<vmem>>, vector<8x84xf32>
    %1 = arith.truncf %0 : vector<8x84xf32> to vector<8x84xbf16>
    %c0_1 = arith.constant 0 : index
    %c0_2 = arith.constant 0 : index
    %2 = vector.load %arg2[%c0_1, %c0_2] : memref<84x256xbf16, #tpu.memory_space<vmem>>, vector<84x256xbf16>
    %cst = arith.constant dense<0.000000e+00> : vector<8x256xf32>
    %3 = tpu.matmul %1, %2, %cst {dimension_numbers = #tpu.dot_dimension_numbers<[1], [0], [0], [1], [0, 0, 1, 1], [], []>} : vector<8x84xbf16>, vector<84x256xbf16>, vector<8x256xf32> -> vector<8x256xf32>
    %c0_3 = arith.constant 0 : index
    %c0_4 = arith.constant 0 : index
    %4 = vector.load %arg3[%c0_3, %c0_4] : memref<1x256xf32, #tpu.memory_space<vmem>>, vector<1x256xf32>
    %5 = vector.broadcast %4 : vector<1x256xf32> to vector<8x256xf32>
    %6 = arith.addf %3, %5 : vector<8x256xf32>
    %cst_5 = arith.constant 0.000000e+00 : f32
    %7 = vector.broadcast %cst_5 : f32 to vector<8x256xf32>
    %8 = arith.maximumf %6, %7 : vector<8x256xf32>
    %9 = arith.truncf %8 : vector<8x256xf32> to vector<8x256xbf16>
    %c0_6 = arith.constant 0 : index
    %c0_7 = arith.constant 0 : index
    %10 = vector.load %arg4[%c0_6, %c0_7] : memref<256x256xbf16, #tpu.memory_space<vmem>>, vector<256x256xbf16>
    %cst_8 = arith.constant dense<0.000000e+00> : vector<8x256xf32>
    %11 = tpu.matmul %9, %10, %cst_8 {dimension_numbers = #tpu.dot_dimension_numbers<[1], [0], [0], [1], [0, 0, 1, 1], [], []>} : vector<8x256xbf16>, vector<256x256xbf16>, vector<8x256xf32> -> vector<8x256xf32>
    %c0_9 = arith.constant 0 : index
    %c0_10 = arith.constant 0 : index
    %12 = vector.load %arg5[%c0_9, %c0_10] : memref<1x256xf32, #tpu.memory_space<vmem>>, vector<1x256xf32>
    %13 = vector.broadcast %12 : vector<1x256xf32> to vector<8x256xf32>
    %14 = arith.addf %11, %13 : vector<8x256xf32>
    %cst_11 = arith.constant 0.000000e+00 : f32
    %15 = vector.broadcast %cst_11 : f32 to vector<8x256xf32>
    %16 = arith.maximumf %14, %15 : vector<8x256xf32>
    %17 = arith.truncf %16 : vector<8x256xf32> to vector<8x256xbf16>
    %c0_12 = arith.constant 0 : index
    %c0_13 = arith.constant 0 : index
    %18 = vector.load %arg6[%c0_12, %c0_13] : memref<256x128xbf16, #tpu.memory_space<vmem>>, vector<256x128xbf16>
    %cst_14 = arith.constant dense<0.000000e+00> : vector<8x128xf32>
    %19 = tpu.matmul %17, %18, %cst_14 {dimension_numbers = #tpu.dot_dimension_numbers<[1], [0], [0], [1], [0, 0, 1, 1], [], []>} : vector<8x256xbf16>, vector<256x128xbf16>, vector<8x128xf32> -> vector<8x128xf32>
    %c0_15 = arith.constant 0 : index
    %c0_16 = arith.constant 0 : index
    %20 = vector.load %arg7[%c0_15, %c0_16] : memref<1x128xf32, #tpu.memory_space<vmem>>, vector<1x128xf32>
    %21 = vector.broadcast %20 : vector<1x128xf32> to vector<8x128xf32>
    %22 = arith.addf %19, %21 : vector<8x128xf32>
    %23 = vector.extract_strided_slice %22 {offsets = [0, 0], sizes = [8, 8], strides = [1, 1]} : vector<8x128xf32> to vector<8x8xf32>
    %cst_17 = arith.constant dense<0xFF800000> : vector<8xf32>
    %24 = vector.multi_reduction <maximumf>, %23, %cst_17 [1] : vector<8x8xf32> to vector<8xf32>
    %25 = vector.shape_cast %24 : vector<8xf32> to vector<8x1xf32>
    %26 = vector.broadcast %25 : vector<8x1xf32> to vector<8x8xf32>
    %27 = arith.subf %23, %26 : vector<8x8xf32>
    %28 = math.exp %27 : vector<8x8xf32>
    %cst_18 = arith.constant dense<0.000000e+00> : vector<8xf32>
    %29 = vector.multi_reduction <add>, %28, %cst_18 [1] : vector<8x8xf32> to vector<8xf32>
    %30 = vector.shape_cast %29 : vector<8xf32> to vector<8x1xf32>
    %31 = tpu.reciprocal %30 : vector<8x1xf32> -> vector<8x1xf32>
    %32 = vector.broadcast %31 : vector<8x1xf32> to vector<8x8xf32>
    %33 = arith.mulf %28, %32 : vector<8x8xf32>
    %c0_19 = arith.constant 0 : index
    %c0_20 = arith.constant 0 : index
    %34 = vector.load %arg8[%c0_19, %c0_20] : memref<8x8xf32, #tpu.memory_space<vmem>>, vector<8x8xf32>
    tpu.vector_store %arg8[%c0_19, %c0_20], %33 {strides = array<i32>} : memref<8x8xf32, #tpu.memory_space<vmem>>, vector<8x8xf32>,
    return
  }
  func.func @transform_0(%arg0: i32) -> (i32, i32) {
    %c0_i32 = arith.constant 0 : i32
    %c0_i32_0 = arith.constant 0 : i32
    return %arg0, %c0_i32 : i32, i32
  }
  func.func @transform_1(%arg0: i32) -> (i32, i32) {
    %c0_i32 = arith.constant 0 : i32
    %c0_i32_0 = arith.constant 0 : i32
    %c0_i32_1 = arith.constant 0 : i32
    return %c0_i32, %c0_i32_0 : i32, i32
  }
  func.func @transform_2(%arg0: i32) -> (i32, i32) {
    %c0_i32 = arith.constant 0 : i32
    %c0_i32_0 = arith.constant 0 : i32
    %c0_i32_1 = arith.constant 0 : i32
    return %c0_i32, %c0_i32_0 : i32, i32
  }
  func.func @transform_3(%arg0: i32) -> (i32, i32) {
    %c0_i32 = arith.constant 0 : i32
    %c0_i32_0 = arith.constant 0 : i32
    %c0_i32_1 = arith.constant 0 : i32
    return %c0_i32, %c0_i32_0 : i32, i32
  }
  func.func @transform_4(%arg0: i32) -> (i32, i32) {
    %c0_i32 = arith.constant 0 : i32
    %c0_i32_0 = arith.constant 0 : i32
    %c0_i32_1 = arith.constant 0 : i32
    return %c0_i32, %c0_i32_0 : i32, i32
  }
  func.func @transform_5(%arg0: i32) -> (i32, i32) {
    %c0_i32 = arith.constant 0 : i32
    %c0_i32_0 = arith.constant 0 : i32
    %c0_i32_1 = arith.constant 0 : i32
    return %c0_i32, %c0_i32_0 : i32, i32
  }
  func.func @transform_6(%arg0: i32) -> (i32, i32) {
    %c0_i32 = arith.constant 0 : i32
    %c0_i32_0 = arith.constant 0 : i32
    %c0_i32_1 = arith.constant 0 : i32
    return %c0_i32, %c0_i32_0 : i32, i32
  }
  func.func @transform_7(%arg0: i32) -> (i32, i32) {
    %c0_i32 = arith.constant 0 : i32
    %c0_i32_0 = arith.constant 0 : i32
    return %arg0, %c0_i32 : i32, i32
  }
}

</mosaic_0001>

<bundles_post_ra>
// kernel: tpu_custom_call.1
= control target key start
LH: loop header
LB: loop body
LE: loop exit
PB: predicated region body
PF: predicated region fallthrough
CT: control target
= control target key end

     0   :  { %12 = vsyncpa [#allocation3], 0  ;;  %s1056_s0 = inlined_call_operand.hbm [shape: f32[2,84], index: 0, kind: input, shape index: {}]   ;;  %s1057_s1 = inlined_call_operand.hbm [shape: bf16[84,256], index: 1, kind: input, shape index: {}]   ;;  %s1058_s2 = inlined_call_operand.vmem [shape: f32[1,256], index: 2, kind: input, shape index: {}]   ;;  %s1059_s3 = inlined_call_operand.hbm [shape: bf16[256,256], index: 3, kind: input, shape index: {}]   ;;  %s1060_s4 = inlined_call_operand.vmem [shape: f32[1,256], index: 4, kind: input, shape index: {}]   ;;  %s1061_s5 = inlined_call_operand.hbm [shape: bf16[256,128], index: 5, kind: input, shape index: {}]   ;;  %s1062_s6 = inlined_call_operand.vmem [shape: f32[1,128], index: 6, kind: input, shape index: {}]   ;;  %s1063_s7 = inlined_call_operand.hbm [shape: f32[2,8], index: 7, kind: output, shape index: {}]  }
   0x1   :  { %13 = vsyncpa [#allocation6], 0 }
   0x2   :  { %14 = vsyncpa [#allocation9], 0 }
   0x3   :  { %15 = vsyncpa [#allocation4], 0 }
   0x4   :  { %20 = vsyncadd [#allocation3], 96  ;;  %s965_s24 = smov [#allocation5]  }
   0x5   :  { %s33_s25 = sshll.u32 %s965_s24, 4  ;;  %s34_s25 = int_to_ptr.vmem [resolvable:$true] %s33_s25 }
   0x6   :  { %s865_s26 = scalar_lea.vmem %s34_s25, 1408  ;;  %p870_p1 = scmp.lt.s32.totalorder %s34_s25, %s34_s25 }
   0x7   :  { %p866_p0 = scmp.ne.s32.totalorder %s34_s25, %s865_s26  ;;  %p871_p2 = scmp.lt.s32.totalorder %s865_s26, %s865_s26 }
   0x9   :  { %p872_p3 = por %p871_p2, %p870_p1 }
   0xb   :  { %p873_p4 = pnand %p872_p3, %p866_p0 }
   0xd   :  { %876 = shalt.err (!%p873_p4)
}
   0xe   :  { %s966_s27 = smov 128   ;;  %s967_s28 = smov 8  }
   0xf   :  { %39 = dma.hbm_to_vmem [thread:$0]  %s1057_s1, 1408, %s34_s25, [#allocation6], %s966_s27, %s966_s27, %s967_s28  }
  0x10   :  { %s968_s8 = smov [#allocation2]  }
  0x11   :  { %s21_s9 = sshll.u32 %s968_s8, 4  ;;  %s22_s9 = int_to_ptr.vmem [resolvable:$true] %s21_s9 }
  0x12   :  { %s885_s10 = scalar_lea.vmem %s22_s9, 32  ;;  %s889_s11 = scalar_lea.vmem %s22_s9, 128 }
  0x13   :  { %p886_p5 = scmp.ne.s32.totalorder %s22_s9, %s885_s10  ;;  %p890_p6 = scmp.lt.s32.totalorder %s22_s9, %s22_s9 }
  0x14   :  { %p891_p7 = scmp.lt.s32.totalorder %s889_s11, %s885_s10 }
  0x16   :  { %p892_p8 = por %p891_p7, %p890_p6 }
  0x18   :  { %p893_p9 = pnand %p892_p8, %p886_p5 }
  0x1a   :  { %896 = shalt.err (!%p893_p9)
}
  0x1b   :  { %s969_s12 = smov 32   ;;  %s970_s13 = smov 2  }
  0x1c   :  { %27 = dma.hbm_to_vmem [thread:$0]  %s1056_s0, 32, %s22_s9, [#allocation3], %s969_s12, %s969_s12, %s970_s13  }
  0x1d   :  { %s971_s1 = smov [#allocation7]   ;;  %s972_s17 = smov [#allocation8]  }
  0x1e   :  { %s47_s16 = sshll.u32 %s971_s1, 4  ;;  %s61_s18 = sshll.u32 %s972_s17, 4  ;;  %s48_s16 = int_to_ptr.vmem [resolvable:$true] %s47_s16  ;;  %s62_s18 = int_to_ptr.vmem [resolvable:$true] %s61_s18 }
  0x1f   :  { %s905_s19 = scalar_lea.vmem %s48_s16, 4096  ;;  %p910_p11 = scmp.lt.s32.totalorder %s48_s16, %s48_s16 }
  0x20   :  { %p906_p10 = scmp.ne.s32.totalorder %s48_s16, %s905_s19  ;;  %p911_p12 = scmp.lt.s32.totalorder %s905_s19, %s905_s19 }
  0x22   :  { %p912_p13 = por %p911_p12, %p910_p11 }
  0x24   :  { %p913_p0 = pnand %p912_p13, %p906_p10 }
  0x26   :  { %916 = shalt.err (!%p913_p0)
}
  0x27   :  { %53 = dma.hbm_to_vmem [thread:$0]  %s1059_s3, 4096, %s48_s16, [#allocation6], %s966_s27, %s966_s27, %s967_s28  }
  0x28   :  { %s925_s0 = scalar_lea.vmem %s62_s18, 2048  ;;  %p930_p2 = scmp.lt.s32.totalorder %s62_s18, %s62_s18 }
  0x29   :  { %p926_p1 = scmp.ne.s32.totalorder %s62_s18, %s925_s0  ;;  %p931_p3 = scmp.lt.s32.totalorder %s925_s0, %s925_s0 }
  0x2b   :  { %p932_p4 = por %p931_p3, %p930_p2 }
  0x2d   :  { %p933_p5 = pnand %p932_p4, %p926_p1 }
  0x2f   :  { %936 = shalt.err (!%p933_p5)
}
  0x30   :  { %s973_s22 = smov 64   ;;  %s974_s23 = smov 4  }
  0x31   :  { %67 = dma.hbm_to_vmem [thread:$0]  %s1061_s5, 2048, %s62_s18, [#allocation9], %s973_s22, %s973_s22, %s974_s23  }
  0x32   :  { %957 = dma.done.wait [#allocation3], 128  }
  0x33   :  { %958 = vsyncadd [#allocation3], 4294967168 }
  0x34   :  { %959 = dma.done.wait [#allocation6], 5504  }
  0x35   :  { %960 = vsyncadd [#allocation6], 4294961792 }
  0x36   :  { %961 = dma.done.wait [#allocation9], 2048  }
  0x37   :  { %962 = vsyncadd [#allocation9], 4294965248  ;;  %v975_v0 = vmov 0   ;;  %v95_v1 = vld [vmem:[#allocation5 + $0x50] sm:$0x33]  ;;  %vm167_vm0 = vcmask 1041408   ;;  %v98_v61 = vlaneseq }
  0x38   :  { %206 = vmatprep.mubr.bf16.mxu0 %v975_v0  ;;  %v686_v2 = vcombine.high %v95_v1, %v95_v1  ;;  %v685_v3 = vcombine.low %v95_v1, %v95_v1  ;;  %v774_v4 = vld [vmem:[#allocation5 + $0x44] ss:$8 sps:$4 sm:$0xff]   ;;  %v776_v6 = vld [vmem:[#allocation5 + $0x40] ss:$8 sps:$4 sm:$0xff]   ;;  %v777_v7 = vld [vmem:[#allocation5 + $0x34] ss:$8 sps:$4 sm:$0xff]  }
  0x39   :  { %v779_v8 = vld [vmem:[#allocation5 + $0x30] ss:$8 sps:$4 sm:$0xff]   ;;  %v789_v9 = vld [vmem:[#allocation7 + $0x74] ss:$8 sps:$4 sm:$0xff]   ;;  %v792_v12 = vld [vmem:[#allocation7 + $0x64] ss:$8 sps:$4 sm:$0xff]  }
  0x3a   :  { %687 = vmatprep.subr.msk.bf16.mxu0 %vm167_vm0, %v686_v2  ;;  %v169_v5 = vsel %vm167_vm0, %v685_v3, 0  ;;  %v791_v10 = vld [vmem:[#allocation7 + $0x70] ss:$8 sps:$4 sm:$0xff]   ;;  %v780_v11 = vld [vmem:[#allocation5 + $0x24] ss:$8 sps:$4 sm:$0xff]   ;;  %423 = vmatprep.subr.bf16.mxu1 %v789_v9  ;;  %v83_v23 = vld [vmem:[#allocation2] sm:$0xff] }
  0x3b   :  { %179 = vmatpush1.bf16.msra.mxu0 %v169_v5  ;;  %424 = vmatpush1.bf16.msra.mxu1 %v791_v10  ;;  %v794_v13 = vld [vmem:[#allocation7 + $0x60] ss:$8 sps:$4 sm:$0xff]   ;;  %v795_v15 = vld [vmem:[#allocation7 + $0x54] ss:$8 sps:$4 sm:$0xff]   ;;  %v797_v17 = vld [vmem:[#allocation7 + $0x50] ss:$8 sps:$4 sm:$0xff]   ;;  %v84_v25 = vpack.c.bf16 %v83_v23, %v83_v23 }
  0x3c   :  { %180 = vmatprep.subr.bf16.mxu0 %v774_v4  ;;  %v782_v14 = vld [vmem:[#allocation5 + $0x20] ss:$8 sps:$4 sm:$0xff]   ;;  %425 = vmatprep.subr.bf16.mxu1 %v792_v12  ;;  %v783_v16 = vld [vmem:[#allocation5 + $0x14] ss:$8 sps:$4 sm:$0xff]   ;;  %v785_v18 = vld [vmem:[#allocation5 + $0x10] ss:$8 sps:$4 sm:$0xff]  }
  0x3d   :  { %v798_v19 = vld [vmem:[#allocation7 + $0x44] ss:$8 sps:$4 sm:$0xff]   ;;  %v788_v21 = vld [vmem:[#allocation5] ss:$8 sps:$4 sm:$0xff]   ;;  %v801_v24 = vld [vmem:[#allocation7 + $0x34] ss:$8 sps:$4 sm:$0xff]  }
  0x3e   :  { %v786_v20 = vld [vmem:[#allocation5 + $0x4] ss:$8 sps:$4 sm:$0xff]   ;;  %v800_v22 = vld [vmem:[#allocation7 + $0x40] ss:$8 sps:$4 sm:$0xff]   ;;  %v803_v26 = vld [vmem:[#allocation7 + $0x30] ss:$8 sps:$4 sm:$0xff]  }
  0x3f   :  { %181 = vmatpush1.bf16.msra.mxu0 %v776_v6  ;;  %426 = vmatpush1.bf16.msra.mxu1 %v794_v13  ;;  %vm163_vm1 = vcmask 687104   ;;  %v804_v27 = vld [vmem:[#allocation7 + $0x24] ss:$8 sps:$4 sm:$0xff]   ;;  %v806_v28 = vld [vmem:[#allocation7 + $0x20] ss:$8 sps:$4 sm:$0xff]   ;;  %v837_v49 = vld [vmem:[#allocation8 + $0x78] sm:$0xff]  }
  0x40   :  { %182 = vmatprep.subr.bf16.mxu0 %v777_v7  ;;  %427 = vmatprep.subr.bf16.mxu1 %v795_v15  ;;  %v807_v29 = vld [vmem:[#allocation7 + $0x14] ss:$8 sps:$4 sm:$0xff]   ;;  %v809_v30 = vld [vmem:[#allocation7 + $0x10] ss:$8 sps:$4 sm:$0xff]   ;;  %v810_v31 = vld [vmem:[#allocation7 + $0x4] ss:$8 sps:$4 sm:$0xff]  }
  0x41   :  { %v812_v32 = vld [vmem:[#allocation7] ss:$8 sps:$4 sm:$0xff]   ;;  %v813_v33 = vld [vmem:[#allocation7 + $0xf4] ss:$8 sps:$4 sm:$0xff]   ;;  %v815_v34 = vld [vmem:[#allocation7 + $0xf0] ss:$8 sps:$4 sm:$0xff]  }
  0x42   :  { %v816_v35 = vld [vmem:[#allocation7 + $0xe4] ss:$8 sps:$4 sm:$0xff]   ;;  %v818_v36 = vld [vmem:[#allocation7 + $0xe0] ss:$8 sps:$4 sm:$0xff]   ;;  %v819_v37 = vld [vmem:[#allocation7 + $0xd4] ss:$8 sps:$4 sm:$0xff]  }
  0x43   :  { %183 = vmatpush1.bf16.msra.mxu0 %v779_v8  ;;  %428 = vmatpush1.bf16.msra.mxu1 %v797_v17  ;;  %v821_v38 = vld [vmem:[#allocation7 + $0xd0] ss:$8 sps:$4 sm:$0xff]   ;;  %v822_v39 = vld [vmem:[#allocation7 + $0xc4] ss:$8 sps:$4 sm:$0xff]   ;;  %v824_v40 = vld [vmem:[#allocation7 + $0xc0] ss:$8 sps:$4 sm:$0xff]  }
  0x44   :  { %184 = vmatprep.subr.bf16.mxu0 %v780_v11  ;;  %429 = vmatprep.subr.bf16.mxu1 %v798_v19  ;;  %v825_v41 = vld [vmem:[#allocation7 + $0xb4] ss:$8 sps:$4 sm:$0xff]   ;;  %v827_v42 = vld [vmem:[#allocation7 + $0xb0] ss:$8 sps:$4 sm:$0xff]   ;;  %v828_v43 = vld [vmem:[#allocation7 + $0xa4] ss:$8 sps:$4 sm:$0xff]  }
  0x45   :  { %v830_v44 = vld [vmem:[#allocation7 + $0xa0] ss:$8 sps:$4 sm:$0xff]   ;;  %v831_v45 = vld [vmem:[#allocation7 + $0x94] ss:$8 sps:$4 sm:$0xff]   ;;  %v833_v46 = vld [vmem:[#allocation7 + $0x90] ss:$8 sps:$4 sm:$0xff]  }
  0x46   :  { %v834_v47 = vld [vmem:[#allocation7 + $0x84] ss:$8 sps:$4 sm:$0xff]   ;;  %v836_v48 = vld [vmem:[#allocation7 + $0x80] ss:$8 sps:$4 sm:$0xff]   ;;  %v838_v50 = vld [vmem:[#allocation8 + $0x38] sm:$0xff]   ;;  %v99_v62 = vshrl.u32 %v98_v61, 7 }
  0x47   :  { %185 = vmatpush1.bf16.msra.mxu0 %v782_v14  ;;  %430 = vmatpush1.bf16.msra.mxu1 %v800_v22  ;;  %v839_v51 = vld [vmem:[#allocation8 + $0x70] sm:$0xff]   ;;  %v841_v53 = vld [vmem:[#allocation8 + $0x68] sm:$0xff]   ;;  %v843_v55 = vld [vmem:[#allocation8 + $0x60] sm:$0xff]   ;;  %vm643_vm2 = vcmask 64512  }
  0x48   :  { %186 = vmatprep.subr.bf16.mxu0 %v783_v16  ;;  %431 = vmatprep.subr.bf16.mxu1 %v801_v24  ;;  %v840_v52 = vld [vmem:[#allocation8 + $0x30] sm:$0xff]   ;;  %v842_v54 = vld [vmem:[#allocation8 + $0x28] sm:$0xff]   ;;  %v844_v56 = vld [vmem:[#allocation8 + $0x20] sm:$0xff]   ;;  %v100_v63 = vsub.s32 0, %v99_v62  ;;  %v104_v1 = vsub.s32 1, %v99_v62 }
  0x49   :  { %v845_v57 = vld [vmem:[#allocation8 + $0x58] sm:$0xff]   ;;  %v847_v59 = vld [vmem:[#allocation8 + $0x50] sm:$0xff]   ;;  %v96_v0 = vld [vmem:[%s1058_s2] sm:$0x3] }
  0x4a   :  { %v846_v58 = vld [vmem:[#allocation8 + $0x18] sm:$0xff]   ;;  %v848_v60 = vld [vmem:[#allocation8 + $0x10] sm:$0xff]   ;;  %v101_v2 = vrot.slane %v96_v0, %v100_v63  ;;  %v105_v3 = vrot.slane %v96_v0, %v104_v1  ;;  %v849_v14 = vld [vmem:[#allocation8 + $0x48] sm:$0xff]  }
  0x4b   :  { %187 = vmatpush1.bf16.msra.mxu0 %v785_v18  ;;  %432 = vmatpush1.bf16.msra.mxu1 %v803_v26  ;;  %v850_v15 = vld [vmem:[#allocation8 + $0x8] sm:$0xff]   ;;  %v851_v16 = vld [vmem:[#allocation8 + $0x40] sm:$0xff]  }
  0x4c   :  { %188 = vmatprep.subr.bf16.mxu0 %v786_v20  ;;  %433 = vmatprep.subr.bf16.mxu1 %v804_v27  ;;  %v852_v17 = vld [vmem:[#allocation8] sm:$0xff]  }
  0x4d   :  { %v251_v18 = vld [vmem:[%s1060_s4] sm:$0x3] }
  0x4e   :  { %v256_v19 = vrot.slane %v251_v18, %v100_v63  ;;  %v260_v20 = vrot.slane %v251_v18, %v104_v1 }
  0x4f   :  { %189 = vmatpush1.bf16.msra.mxu0 %v788_v21  ;;  %434 = vmatpush1.bf16.msra.mxu1 %v806_v28 }
  0x50   :  { %435 = vmatprep.subr.bf16.mxu1 %v807_v29  ;;  %738 = vmatprep.subr.bf16.mxu0 %v837_v49 }
  0x52   :  { %688 = vmatmul.mubr.msk.bf16.vlgmr.msra.gmra.mxu0 %vm163_vm1, %v84_v25 }
  0x53   :  { %436 = vmatpush1.bf16.msra.mxu1 %v809_v30  ;;  %739 = vmatpush3.bf16.msra.mxu0 %v838_v50 }
  0x54   :  { %437 = vmatprep.subr.bf16.mxu1 %v810_v31  ;;  %740 = vmatprep.subr.bf16.mxu0 %v839_v51 }
  0x57   :  { %438 = vmatpush1.bf16.msra.mxu1 %v812_v32  ;;  %741 = vmatpush3.bf16.msra.mxu0 %v840_v52 }
  0x58   :  { %439 = vmatprep.subr.bf16.mxu1 %v813_v33  ;;  %742 = vmatprep.subr.bf16.mxu0 %v841_v53  ;;  %v721_v33 = vld [vmem:[%s1062_s6] ss:$0 sm:$0xff] }
  0x5b   :  { %440 = vmatpush2.bf16.msra.mxu1 %v815_v34  ;;  %743 = vmatpush3.bf16.msra.mxu0 %v842_v54 }
  0x5c   :  { %441 = vmatprep.subr.bf16.mxu1 %v816_v35  ;;  %744 = vmatprep.subr.bf16.mxu0 %v843_v55 }
  0x5f   :  { %442 = vmatpush2.bf16.msra.mxu1 %v818_v36  ;;  %745 = vmatpush3.bf16.msra.mxu0 %v844_v56 }
  0x60   :  { %443 = vmatprep.subr.bf16.mxu1 %v819_v37  ;;  %746 = vmatprep.subr.bf16.mxu0 %v845_v57 }
  0x63   :  { %444 = vmatpush2.bf16.msra.mxu1 %v821_v38  ;;  %747 = vmatpush3.bf16.msra.mxu0 %v846_v58 }
  0x64   :  { %445 = vmatprep.subr.bf16.mxu1 %v822_v39  ;;  %748 = vmatprep.subr.bf16.mxu0 %v847_v59 }
  0x67   :  { %446 = vmatpush2.bf16.msra.mxu1 %v824_v40  ;;  %749 = vmatpush3.bf16.msra.mxu0 %v848_v60 }
  0x68   :  { %447 = vmatprep.subr.bf16.mxu1 %v825_v41  ;;  %750 = vmatprep.subr.bf16.mxu0 %v849_v14 }
  0x6b   :  { %448 = vmatpush2.bf16.msra.mxu1 %v827_v42  ;;  %751 = vmatpush3.bf16.msra.mxu0 %v850_v15 }
  0x6c   :  { %449 = vmatprep.subr.bf16.mxu1 %v828_v43  ;;  %752 = vmatprep.subr.bf16.mxu0 %v851_v16 }
  0x6f   :  { %450 = vmatpush2.bf16.msra.mxu1 %v830_v44  ;;  %753 = vmatpush3.bf16.msra.mxu0 %v852_v17 }
  0x70   :  { %451 = vmatprep.subr.bf16.mxu1 %v831_v45 }
  0x73   :  { %452 = vmatpush2.bf16.msra.mxu1 %v833_v46 }
  0x74   :  { %453 = vmatprep.subr.bf16.mxu1 %v834_v47 }
  0x77   :  { %454 = vmatpush2.bf16.msra.mxu1 %v836_v48 }
 0x112   :  { %v208_v4 = vpop.f32.mrf.mxu0 }
 0x113   :  { %v209_v5 = vadd.f32 %v208_v4, %v101_v2 }
 0x114   :  { %v210_v6 = vpop.f32.mrf.mxu0 }
 0x115   :  { %v211_v7 = vadd.f32 %v210_v6, %v105_v3  ;;  %v215_v8 = vmax.f32 %v209_v5, 0.0 }
 0x116   :  { %v212_v9 = vpop.f32.mrf.mxu0 }
 0x117   :  { %v216_v10 = vmax.f32 %v211_v7, 0.0  ;;  %v217_v13 = vpack.c.bf16 %v215_v8, %v215_v8 }
 0x118   :  { %v213_v11 = vpop.f32.mrf.mxu0 }
 0x119   :  { %v218_v12 = vpack.c.bf16 %v216_v10, %v216_v10 }
 0x11b   :  { %455 = vmatprep.mubr.bf16.mxu1 %v218_v12 }
 0x11c   :  { %456 = vmatmul.mubr.bf16.vlgmr.msra.gmra.mxu1 %v217_v13 }
 0x1dc   :  { %v457_v21 = vpop.f32.mrf.mxu1 }
 0x1dd   :  { %v458_v22 = vadd.f32 %v457_v21, %v256_v19 }
 0x1de   :  { %v459_v23 = vpop.f32.mrf.mxu1 }
 0x1df   :  { %v460_v24 = vadd.f32 %v459_v23, %v260_v20  ;;  %v464_v25 = vmax.f32 %v458_v22, 0.0 }
 0x1e0   :  { %v461_v26 = vpop.f32.mrf.mxu1 }
 0x1e1   :  { %v465_v27 = vmax.f32 %v460_v24, 0.0  ;;  %v466_v30 = vpack.c.bf16 %v464_v25, %v464_v25 }
 0x1e2   :  { %v462_v28 = vpop.f32.mrf.mxu1 }
 0x1e3   :  { %v467_v29 = vpack.c.bf16 %v465_v27, %v465_v27 }
 0x1e5   :  { %635 = vmatprep.mubr.bf16.mxu0 %v467_v29 }
 0x1e6   :  { %636 = vmatmul.mubr.bf16.vlgmr.msra.gmra.mxu0 %v466_v30 }
 0x2a6   :  { %v754_v31 = vpop.f32.mrf.mxu0 }
 0x2a8   :  { %v755_v32 = vpop.f32.mrf.mxu0 }
 0x2a9   :  { %v756_v34 = vadd.f32 %v755_v32, %v754_v31 }
 0x2aa   :  { %v757_v35 = vpop.f32.mrf.mxu0 }
 0x2ab   :  { %v638_v36 = vadd.f32 %v756_v34, %v721_v33 }
 0x2ac   :  { %v758_v37 = vpop.f32.mrf.mxu0 }
 0x2ad   :  { %v644_v38 = vsel %vm643_vm2, %v638_v36, -inf }
 0x2ae   :  { %645 = vmax.xlane.f32.xlu0 %v644_v38 }
 0x337   :  { %v646_v39 = vpop.xlane.xlu0 %645 }
 0x338   :  { %v647_v40 = vsub.f32 %v638_v36, %v646_v39 }
 0x33a   :  { %v648_v41 = vmul.f32 1.442695, %v647_v40 }
 0x33c   :  { %853 = vpow2.f32 %v648_v41 }
 0x349   :  { %v854_v42 = vpop.eup %853 }
 0x34a   :  { %v650_v43 = vsel %vm643_vm2, %v854_v42, 0.0 }
 0x34b   :  { %651 = vadd.xlane.f32.xlu0 %v650_v43 }
 0x3d4   :  { %v652_v44 = vpop.xlane.xlu0 %651 }
 0x3d5   :  { %855 = vrcp.f32 %v652_v44 }
 0x3e2   :  { %v856_v45 = vpop.eup %855 }
 0x3e3   :  { %v654_v46 = vmul.f32 %v856_v45, %v854_v42 }
 0x3e5   :  { %655 = vst.msk [vmem:[#allocation10] sm:$0xff] %vm643_vm2, %v654_v46 }
 0x3e6   :  { %660 = vsyncadd [#allocation4], 96  ;;  %s976_s4 = smov [#allocation10]  }
 0x3e7   :  { %s661_s6 = sshll.u32 %s976_s4, 4  ;;  %s662_s6 = int_to_ptr.vmem [resolvable:$true] %s661_s6 }
 0x3e8   :  { %s937_s29 = scalar_lea.vmem %s662_s6, 32  ;;  %s941_s30 = scalar_lea.vmem %s662_s6, 128 }
 0x3e9   :  { %p938_p6 = scmp.ne.s32.totalorder %s662_s6, %s937_s29  ;;  %p942_p7 = scmp.lt.s32.totalorder %s662_s6, %s662_s6 }
 0x3ea   :  { %p943_p8 = scmp.lt.s32.totalorder %s941_s30, %s937_s29 }
 0x3ec   :  { %p944_p9 = por %p943_p8, %p942_p7 }
 0x3ee   :  { %p945_p10 = pnand %p944_p9, %p938_p6 }
 0x3f0   :  { %948 = shalt.err (!%p945_p10)
}
 0x3f1   :  { %667 = dma.vmem_to_hbm [thread:$0]  %s662_s6, 32, %s1063_s7, [#allocation4], %s969_s12, %s969_s12, %s970_s13  }
 0x3f2   :  { %963 = dma.done.wait [#allocation4], 128  }
 0x3f3   :  { %964 = vsyncadd [#allocation4], 4294967168 }
 0x3f4   :  { %671 = vsyncpa [#allocation3], 1 }
 0x3f5   :  { %672 = vsyncpa [#allocation6], 1 }
 0x3f6   :  { %673 = vsyncpa [#allocation9], 1 }
 0x3f7   :  { %674 = vsyncpa [#allocation4], 1 }

</bundles_post_ra>
